<compile_context>
chip_gen: v6e
topology: v6e:2x2x1
jax: 0.10.0
libtpu: 0.0.40
codegen_flags: <defaults>
</compile_context>

<pallas_src>
import jax
import jax.numpy as jnp
from jax.experimental import pallas as pl
from jax.experimental.pallas import tpu as pltpu


def _round_up(n, m):
    return ((n + m - 1) // m) * m


def _cdiv(a, b):
    return -(-a // b)


def _sigmoid(z):
    # 1 / (1 + exp(-z)): exp on the EUP, approximate reciprocal on the EUP,
    # one Newton-Raphson step on the VPU to recover ~full f32 precision.
    d = 1.0 + jnp.exp(-z)
    r = pl.reciprocal(d, approx=True)
    return r * (2.0 - d * r)


def _mlp_kernel(p_ref, x_ref, o_ref):
    # p_ref: SMEM f32[13] packed as
    #   [w1[0,0], w1[0,1], w1[0,2], w1[1,0], w1[1,1], w1[1,2],
    #    b1[0],   b1[1],   b1[2],
    #    w2[0],   w2[1],   w2[2],   b2]
    # x_ref: VMEM (2, rt, 128)  -- features on the leading axis, samples dense
    #                              on sublanes (rt) and lanes (128).
    # o_ref: VMEM (rt, 128)
    x0 = x_ref[0]                                        # (rt, 128)
    x1 = x_ref[1]                                        # (rt, 128)

    # Layer 1: three scalar-broadcast FMAs per hidden unit + sigmoid.
    h0 = _sigmoid(x0 * p_ref[0] + x1 * p_ref[3] + p_ref[6])
    h1 = _sigmoid(x0 * p_ref[1] + x1 * p_ref[4] + p_ref[7])
    h2 = _sigmoid(x0 * p_ref[2] + x1 * p_ref[5] + p_ref[8])

    # Layer 2: three FMAs + sigmoid.
    y = _sigmoid(h0 * p_ref[9] + h1 * p_ref[10] + h2 * p_ref[11] + p_ref[12])

    o_ref[...] = y.astype(o_ref.dtype)


def triangle_reconstructor_forward(x, w1, b1, w2, b2, *, max_row_tile=2048):
    """x: (B, 2); w1: (2, 3); b1: (3,); w2: (3, 1) or (3,); b2: scalar-ish.

    Returns (B, 1), matching TriangleReconstructorModel.forward.
    """
    B = x.shape[0]
    if B == 0:                                           # degenerate batch
        return jnp.zeros((0, 1), jnp.float32)
    x = x.astype(jnp.float32)

    # Samples are laid out 128 per lane-row; R rows cover the batch.
    R = _cdiv(B, 128)

    # Row tile: multiple of 8 sublanes, up to ~2 MiB of input per grid step.
    rt = min(max_row_tile, _round_up(R, 8))
    if R > 8:
        # Guarantee >= 2 grid steps so the "parallel" batch axis can shard
        # across v7x's two TensorCores.
        rt = min(rt, _round_up(_cdiv(R, 2), 8))
    rt = max(8, _round_up(rt, 8))

    Rp = _round_up(R, rt)
    Bp = Rp * 128

    # One pad+transpose pass, then a metadata-only reshape: (B,2) -> (2,Rp,128).
    xp = jnp.zeros((Bp, 2), jnp.float32).at[:B, :].set(x)
    xt = xp.T.reshape(2, Rp, 128)

    # Pack the 13 parameters into one SMEM-resident f32 vector.
    params = jnp.concatenate([
        jnp.asarray(w1, jnp.float32).reshape(-1),        # 6: w1[i, j] at 3*i + j
        jnp.asarray(b1, jnp.float32).reshape(-1),        # 3
        jnp.asarray(w2, jnp.float32).reshape(-1),        # 3
        jnp.asarray(b2, jnp.float32).reshape(-1),        # 1
    ])

    out = pl.pallas_call(
        _mlp_kernel,
        out_shape=jax.ShapeDtypeStruct((Rp, 128), jnp.float32),
        grid=(Rp // rt,),
        in_specs=[
            pl.BlockSpec(memory_space=pltpu.MemorySpace.SMEM),    # params, pinned
            pl.BlockSpec((2, rt, 128), lambda i: (0, i, 0)),      # dense x tile
        ],
        out_specs=pl.BlockSpec((rt, 128), lambda i: (i, 0)),
        compiler_params=pltpu.CompilerParams(
            dimension_semantics=("parallel",),                    # megacore on v7x
        ),
    )(params, xt)

    if B == Bp:
        # Aligned batch: metadata-only reshape, no extra HBM pass.
        return out.reshape(B, 1)
    return out.reshape(-1)[:B].reshape(B, 1)


def init_params(key):
    # Deterministic init mimicking torch.nn.Linear default:
    # U(-1/sqrt(fan_in), 1/sqrt(fan_in)) for both weight and bias.
    k1, k2, k3, k4 = jax.random.split(key, 4)
    bound1 = 1.0 / jnp.sqrt(2.0)   # layer1 fan_in = 2
    bound2 = 1.0 / jnp.sqrt(3.0)   # layer2 fan_in = 3
    # Stored pre-transposed as (in, out) for x @ W.
    w1 = jax.random.uniform(k1, (2, 3), jnp.float32, -bound1, bound1)
    b1 = jax.random.uniform(k2, (3,), jnp.float32, -bound1, bound1)
    w2 = jax.random.uniform(k3, (3, 1), jnp.float32, -bound2, bound2)
    b2 = jax.random.uniform(k4, (1,), jnp.float32, -bound2, bound2)
    return w1, b1, w2, b2


def reference_forward(x, w1, b1, w2, b2):
    h = jax.nn.sigmoid(x @ w1 + b1[None, :])
    return jax.nn.sigmoid(h @ w2 + b2[None, :])


if __name__ == "__main__":
    key = jax.random.PRNGKey(0)
    kx, kp, kx2, kx3 = jax.random.split(key, 4)

    w1, b1, w2, b2 = init_params(kp)

    # Small canonical shape (single grid step, padded rows/lanes).
    B = 8
    x = jax.random.normal(kx, (B, 2), dtype=jnp.float32)
    out = triangle_reconstructor_forward(x, w1, b1, w2, b2)
    out = jax.block_until_ready(out)
    ref = reference_forward(x, w1, b1, w2, b2)
    assert out.shape == (B, 1), out.shape
    assert jnp.allclose(out, ref, atol=1e-5, rtol=1e-5)

    # Non-multiple-of-128 batch: exercises the padded-tail + final-slice path.
    B2 = 300
    x2 = jax.random.normal(kx2, (B2, 2), dtype=jnp.float32)
    out2 = triangle_reconstructor_forward(x2, w1, b1, w2, b2)
    out2 = jax.block_until_ready(out2)
    ref2 = reference_forward(x2, w1, b1, w2, b2)
    assert out2.shape == (B2, 1), out2.shape
    assert jnp.allclose(out2, ref2, atol=1e-5, rtol=1e-5)

    # Larger batch: exercises the multi-step (>=2) pipelined grid path.
    B3 = 3000
    x3 = jax.random.normal(kx3, (B3, 2), dtype=jnp.float32)
    out3 = triangle_reconstructor_forward(x3, w1, b1, w2, b2)
    out3 = jax.block_until_ready(out3)
    ref3 = reference_forward(x3, w1, b1, w2, b2)
    assert out3.shape == (B3, 1), out3.shape
    assert jnp.allclose(out3, ref3, atol=1e-5, rtol=1e-5)

    print("KERNEL_OK")
</pallas_src>

<mosaic_0001>
module attributes {stable_mosaic.version = 11 : i64} {
  func.func @_mlp_kernel(%arg0: i32, %arg1: memref<13xf32, #tpu.memory_space<smem>>, %arg2: memref<2x8x128xf32, #tpu.memory_space<vmem>>, %arg3: memref<8x128xf32, #tpu.memory_space<vmem>>) attributes {dimension_semantics = [#tpu.dimension_semantics<parallel>], iteration_bounds = array<i64: 1>, scalar_prefetch = 0 : i64, scratch_operands = 0 : i64, tpu.core_type = #tpu.core_type<tc>, window_params = [{transform_indices = @transform_0, window_bounds = array<i64: 13>}, {transform_indices = @transform_1, window_bounds = array<i64: 2, 8, 128>}, {transform_indices = @transform_2, window_bounds = array<i64: 8, 128>}]} {
    %c0 = arith.constant 0 : index
    %c0_0 = arith.constant 0 : index
    %c0_1 = arith.constant 0 : index
    %0 = vector.load %arg2[%c0, %c0_0, %c0_1] : memref<2x8x128xf32, #tpu.memory_space<vmem>>, vector<1x8x128xf32>
    %1 = vector.shape_cast %0 : vector<1x8x128xf32> to vector<8x128xf32>
    %c1 = arith.constant 1 : index
    %c0_2 = arith.constant 0 : index
    %c0_3 = arith.constant 0 : index
    %2 = vector.load %arg2[%c1, %c0_2, %c0_3] : memref<2x8x128xf32, #tpu.memory_space<vmem>>, vector<1x8x128xf32>
    %3 = vector.shape_cast %2 : vector<1x8x128xf32> to vector<8x128xf32>
    %c0_4 = arith.constant 0 : index
    %4 = memref.load %arg1[%c0_4] : memref<13xf32, #tpu.memory_space<smem>>
    %5 = vector.broadcast %4 : f32 to vector<8x128xf32>
    %6 = arith.mulf %1, %5 : vector<8x128xf32>
    %c3 = arith.constant 3 : index
    %7 = memref.load %arg1[%c3] : memref<13xf32, #tpu.memory_space<smem>>
    %8 = vector.broadcast %7 : f32 to vector<8x128xf32>
    %9 = arith.mulf %3, %8 : vector<8x128xf32>
    %10 = arith.addf %6, %9 : vector<8x128xf32>
    %c6 = arith.constant 6 : index
    %11 = memref.load %arg1[%c6] : memref<13xf32, #tpu.memory_space<smem>>
    %12 = vector.broadcast %11 : f32 to vector<8x128xf32>
    %13 = arith.addf %10, %12 : vector<8x128xf32>
    %cst = arith.constant 0.000000e+00 : f32
    %14 = vector.broadcast %cst : f32 to vector<8x128xf32>
    %15 = arith.subf %14, %13 : vector<8x128xf32>
    %16 = math.exp %15 : vector<8x128xf32>
    %cst_5 = arith.constant 1.000000e+00 : f32
    %17 = vector.broadcast %cst_5 : f32 to vector<8x128xf32>
    %18 = arith.addf %17, %16 : vector<8x128xf32>
    %19 = tpu.reciprocal %18 {approx = true} : vector<8x128xf32> -> vector<8x128xf32>
    %20 = arith.mulf %18, %19 : vector<8x128xf32>
    %cst_6 = arith.constant 2.000000e+00 : f32
    %21 = vector.broadcast %cst_6 : f32 to vector<8x128xf32>
    %22 = arith.subf %21, %20 : vector<8x128xf32>
    %23 = arith.mulf %19, %22 : vector<8x128xf32>
    %c1_7 = arith.constant 1 : index
    %24 = memref.load %arg1[%c1_7] : memref<13xf32, #tpu.memory_space<smem>>
    %25 = vector.broadcast %24 : f32 to vector<8x128xf32>
    %26 = arith.mulf %1, %25 : vector<8x128xf32>
    %c4 = arith.constant 4 : index
    %27 = memref.load %arg1[%c4] : memref<13xf32, #tpu.memory_space<smem>>
    %28 = vector.broadcast %27 : f32 to vector<8x128xf32>
    %29 = arith.mulf %3, %28 : vector<8x128xf32>
    %30 = arith.addf %26, %29 : vector<8x128xf32>
    %c7 = arith.constant 7 : index
    %31 = memref.load %arg1[%c7] : memref<13xf32, #tpu.memory_space<smem>>
    %32 = vector.broadcast %31 : f32 to vector<8x128xf32>
    %33 = arith.addf %30, %32 : vector<8x128xf32>
    %cst_8 = arith.constant 0.000000e+00 : f32
    %34 = vector.broadcast %cst_8 : f32 to vector<8x128xf32>
    %35 = arith.subf %34, %33 : vector<8x128xf32>
    %36 = math.exp %35 : vector<8x128xf32>
    %cst_9 = arith.constant 1.000000e+00 : f32
    %37 = vector.broadcast %cst_9 : f32 to vector<8x128xf32>
    %38 = arith.addf %37, %36 : vector<8x128xf32>
    %39 = tpu.reciprocal %38 {approx = true} : vector<8x128xf32> -> vector<8x128xf32>
    %40 = arith.mulf %38, %39 : vector<8x128xf32>
    %cst_10 = arith.constant 2.000000e+00 : f32
    %41 = vector.broadcast %cst_10 : f32 to vector<8x128xf32>
    %42 = arith.subf %41, %40 : vector<8x128xf32>
    %43 = arith.mulf %39, %42 : vector<8x128xf32>
    %c2 = arith.constant 2 : index
    %44 = memref.load %arg1[%c2] : memref<13xf32, #tpu.memory_space<smem>>
    %45 = vector.broadcast %44 : f32 to vector<8x128xf32>
    %46 = arith.mulf %1, %45 : vector<8x128xf32>
    %c5 = arith.constant 5 : index
    %47 = memref.load %arg1[%c5] : memref<13xf32, #tpu.memory_space<smem>>
    %48 = vector.broadcast %47 : f32 to vector<8x128xf32>
    %49 = arith.mulf %3, %48 : vector<8x128xf32>
    %50 = arith.addf %46, %49 : vector<8x128xf32>
    %c8 = arith.constant 8 : index
    %51 = memref.load %arg1[%c8] : memref<13xf32, #tpu.memory_space<smem>>
    %52 = vector.broadcast %51 : f32 to vector<8x128xf32>
    %53 = arith.addf %50, %52 : vector<8x128xf32>
    %cst_11 = arith.constant 0.000000e+00 : f32
    %54 = vector.broadcast %cst_11 : f32 to vector<8x128xf32>
    %55 = arith.subf %54, %53 : vector<8x128xf32>
    %56 = math.exp %55 : vector<8x128xf32>
    %cst_12 = arith.constant 1.000000e+00 : f32
    %57 = vector.broadcast %cst_12 : f32 to vector<8x128xf32>
    %58 = arith.addf %57, %56 : vector<8x128xf32>
    %59 = tpu.reciprocal %58 {approx = true} : vector<8x128xf32> -> vector<8x128xf32>
    %60 = arith.mulf %58, %59 : vector<8x128xf32>
    %cst_13 = arith.constant 2.000000e+00 : f32
    %61 = vector.broadcast %cst_13 : f32 to vector<8x128xf32>
    %62 = arith.subf %61, %60 : vector<8x128xf32>
    %63 = arith.mulf %59, %62 : vector<8x128xf32>
    %c9 = arith.constant 9 : index
    %64 = memref.load %arg1[%c9] : memref<13xf32, #tpu.memory_space<smem>>
    %65 = vector.broadcast %64 : f32 to vector<8x128xf32>
    %66 = arith.mulf %23, %65 : vector<8x128xf32>
    %c10 = arith.constant 10 : index
    %67 = memref.load %arg1[%c10] : memref<13xf32, #tpu.memory_space<smem>>
    %68 = vector.broadcast %67 : f32 to vector<8x128xf32>
    %69 = arith.mulf %43, %68 : vector<8x128xf32>
    %70 = arith.addf %66, %69 : vector<8x128xf32>
    %c11 = arith.constant 11 : index
    %71 = memref.load %arg1[%c11] : memref<13xf32, #tpu.memory_space<smem>>
    %72 = vector.broadcast %71 : f32 to vector<8x128xf32>
    %73 = arith.mulf %63, %72 : vector<8x128xf32>
    %74 = arith.addf %70, %73 : vector<8x128xf32>
    %c12 = arith.constant 12 : index
    %75 = memref.load %arg1[%c12] : memref<13xf32, #tpu.memory_space<smem>>
    %76 = vector.broadcast %75 : f32 to vector<8x128xf32>
    %77 = arith.addf %74, %76 : vector<8x128xf32>
    %cst_14 = arith.constant 0.000000e+00 : f32
    %78 = vector.broadcast %cst_14 : f32 to vector<8x128xf32>
    %79 = arith.subf %78, %77 : vector<8x128xf32>
    %80 = math.exp %79 : vector<8x128xf32>
    %cst_15 = arith.constant 1.000000e+00 : f32
    %81 = vector.broadcast %cst_15 : f32 to vector<8x128xf32>
    %82 = arith.addf %81, %80 : vector<8x128xf32>
    %83 = tpu.reciprocal %82 {approx = true} : vector<8x128xf32> -> vector<8x128xf32>
    %84 = arith.mulf %82, %83 : vector<8x128xf32>
    %cst_16 = arith.constant 2.000000e+00 : f32
    %85 = vector.broadcast %cst_16 : f32 to vector<8x128xf32>
    %86 = arith.subf %85, %84 : vector<8x128xf32>
    %87 = arith.mulf %83, %86 : vector<8x128xf32>
    %c0_17 = arith.constant 0 : index
    %c0_18 = arith.constant 0 : index
    %88 = vector.load %arg3[%c0_17, %c0_18] : memref<8x128xf32, #tpu.memory_space<vmem>>, vector<8x128xf32>
    tpu.vector_store %arg3[%c0_17, %c0_18], %87 {strides = array<i32>} : memref<8x128xf32, #tpu.memory_space<vmem>>, vector<8x128xf32>,
    return
  }
  func.func @transform_0(%arg0: i32) -> i32 {
    %c0_i32 = arith.constant 0 : i32
    %c0_i32_0 = arith.constant 0 : i32
    return %c0_i32 : i32
  }
  func.func @transform_1(%arg0: i32) -> (i32, i32, i32) {
    %c0_i32 = arith.constant 0 : i32
    %c0_i32_0 = arith.constant 0 : i32
    %c0_i32_1 = arith.constant 0 : i32
    return %c0_i32, %arg0, %c0_i32_0 : i32, i32, i32
  }
  func.func @transform_2(%arg0: i32) -> (i32, i32) {
    %c0_i32 = arith.constant 0 : i32
    %c0_i32_0 = arith.constant 0 : i32
    return %arg0, %c0_i32 : i32, i32
  }
}

</mosaic_0001>

<bundles_post_ra>
// kernel: tpu_custom_call.1
= control target key start
LH: loop header
LB: loop body
LE: loop exit
PB: predicated region body
PF: predicated region fallthrough
CT: control target
= control target key end

     0   :  { %7 = vsyncpa [#allocation5], 0  ;;  %s249_s0 = inlined_call_operand.hbm [shape: f32[13], index: 0, kind: input, shape index: {}]   ;;  %s250_s1 = inlined_call_operand.hbm [shape: f32[2,8,128], index: 1, kind: input, shape index: {}]   ;;  %s251_s2 = inlined_call_operand.hbm [shape: f32[8,128], index: 2, kind: output, shape index: {}]  }
   0x1   :  { %8 = vsyncpa [#allocation3], 0 }
   0x2   :  { %9 = vsyncpa [#allocation4], 0  ;;  %s220_s9 = smov [#allocation2]   ;;  %s221_s12 = smov [#allocation6]  }
   0x3   :  { %17 = dma.hbm_to_smem %s249_s0, 16, %s220_s9, [#allocation5]  }
   0x4   :  { %s23_s13 = sshll.u32 %s221_s12, 4  ;;  %s24_s13 = int_to_ptr.vmem [resolvable:$true] %s23_s13 }
   0x5   :  { %s182_s14 = scalar_lea.vmem %s24_s13, 256  ;;  %p187_p1 = scmp.lt.s32.totalorder %s24_s13, %s24_s13 }
   0x6   :  { %p183_p0 = scmp.ne.s32.totalorder %s24_s13, %s182_s14  ;;  %p188_p2 = scmp.lt.s32.totalorder %s182_s14, %s182_s14 }
   0x8   :  { %p189_p3 = por %p188_p2, %p187_p1 }
   0xa   :  { %p190_p4 = pnand %p189_p3, %p183_p0 }
   0xc   :  { %193 = shalt.err (!%p190_p4)
}
   0xd   :  { %s222_s15 = smov 128   ;;  %s223_s16 = smov 8  }
   0xe   :  { %29 = dma.hbm_to_vmem [thread:$0]  %s250_s1, 256, %s24_s13, [#allocation3], %s222_s15, %s222_s15, %s223_s16  }
   0xf   :  { %214 = dma.done.wait [#allocation5], 16  }
  0x10   :  { %215 = vsyncadd [#allocation5], 4294967280 }
  0x11   :  { %216 = dma.done.wait [#allocation3], 256  }
  0x12   :  { %217 = vsyncadd [#allocation3], 4294967040 }
  0x13   :  { %36 = sfence }
  0x14   :  { %s40_s0 = sld [smem:[#allocation2]]  ;;  %v37_v0 = vld [vmem:[#allocation6] sm:$0xff]  ;;  %v39_v1 = vld [vmem:[#allocation6 + $0x8] sm:$0xff]  ;;  %s224_s30 = smov [#allocation7]  }
  0x15   :  { %s133_s19 = sld [smem:[#allocation2 + $0x3]]  ;;  %s123_s3 = sshll.u32 %s224_s30, 4  ;;  %s124_s3 = int_to_ptr.vmem [resolvable:$true] %s123_s3 }
  0x16   :  { %s134_s20 = sld [smem:[#allocation2 + $0x6]]  ;;  %s194_s4 = scalar_lea.vmem %s124_s3, 128 }
  0x17   :  { %s135_s21 = sld [smem:[#allocation2 + $0x1]]  ;;  %p195_p5 = scmp.ne.s32.totalorder %s124_s3, %s194_s4 }
  0x18   :  { %s136_s22 = sld [smem:[#allocation2 + $0x4]]  ;;  %p199_p6 = scmp.lt.s32.totalorder %s124_s3, %s124_s3 }
  0x19   :  { %s137_s23 = sld [smem:[#allocation2 + $0x7]]  ;;  %p200_p7 = scmp.lt.s32.totalorder %s194_s4, %s194_s4 }
  0x1a   :  { %v41_v2 = vstv %s40_s0  ;;  %s138_s24 = sld [smem:[#allocation2 + $0x2]] }
  0x1b   :  { %v42_v3 = vmul.f32 %v41_v2, %v37_v0  ;;  %v44_v4 = vstv %s133_s19  ;;  %s139_s25 = sld [smem:[#allocation2 + $0x5]]  ;;  %p201_p8 = por %p200_p7, %p199_p6 }
  0x1c   :  { %v45_v5 = vmul.f32 %v44_v4, %v39_v1  ;;  %s140_s1 = sld [smem:[#allocation2 + $0x8]]  ;;  %v48_v6 = vstv %s134_s20 }
  0x1d   :  { %v59_v7 = vstv %s135_s21  ;;  %s141_s26 = sld [smem:[#allocation2 + $0x9]]  ;;  %p202_p9 = pnand %p201_p8, %p195_p5 }
  0x1e   :  { %v46_v8 = vadd.f32 %v45_v5, %v42_v3  ;;  %v60_v9 = vmul.f32 %v59_v7, %v37_v0  ;;  %v62_v10 = vstv %s136_s22  ;;  %s142_s27 = sld [smem:[#allocation2 + $0xa]] }
  0x1f   :  { %v63_v11 = vmul.f32 %v62_v10, %v39_v1  ;;  %v66_v13 = vstv %s137_s23  ;;  %s143_s28 = sld [smem:[#allocation2 + $0xb]] }
  0x20   :  { %v49_v12 = vadd.f32 %v48_v6, %v46_v8  ;;  %v77_v14 = vstv %s138_s24  ;;  %s144_s29 = sld [smem:[#allocation2 + $0xc]] }
  0x21   :  { %v64_v15 = vadd.f32 %v63_v11, %v60_v9  ;;  %v78_v16 = vmul.f32 %v77_v14, %v37_v0  ;;  %v80_v17 = vstv %s139_s25 }
  0x22   :  { %v50_v18 = vsub.f32 0.0, %v49_v12  ;;  %v81_v19 = vmul.f32 %v80_v17, %v39_v1  ;;  %v84_v21 = vstv %s140_s1 }
  0x23   :  { %v67_v20 = vadd.f32 %v66_v13, %v64_v15  ;;  %v95_v41 = vstv %s141_s26 }
  0x24   :  { %v51_v22 = vmul.f32 1.442695, %v50_v18  ;;  %v82_v23 = vadd.f32 %v81_v19, %v78_v16  ;;  %v98_v45 = vstv %s142_s27 }
  0x25   :  { %v68_v24 = vsub.f32 0.0, %v67_v20  ;;  %v102_v50 = vstv %s143_s28 }
  0x26   :  { %150 = vpow2.f32 %v51_v22  ;;  %v85_v25 = vadd.f32 %v84_v21, %v82_v23  ;;  %v106_v54 = vstv %s144_s29 }
  0x27   :  { %v69_v26 = vmul.f32 1.442695, %v68_v24 }
  0x28   :  { %v86_v27 = vsub.f32 0.0, %v85_v25 }
  0x29   :  { %152 = vpow2.f32 %v69_v26 }
  0x2a   :  { %v87_v28 = vmul.f32 1.442695, %v86_v27 }
  0x2c   :  { %154 = vpow2.f32 %v87_v28 }
  0x33   :  { %v151_v29 = vpop.eup %150 }
  0x34   :  { %v53_v30 = vadd.f32 1.0, %v151_v29 }
  0x36   :  { %v153_v31 = vpop.eup %152  ;;  %156 = vrcp.f32 %v53_v30 }
  0x37   :  { %v71_v32 = vadd.f32 1.0, %v153_v31 }
  0x39   :  { %v155_v33 = vpop.eup %154  ;;  %158 = vrcp.f32 %v71_v32 }
  0x3a   :  { %v89_v34 = vadd.f32 1.0, %v155_v33 }
  0x3c   :  { %160 = vrcp.f32 %v89_v34 }
  0x43   :  { %v157_v35 = vpop.eup %156 }
  0x44   :  { %v55_v36 = vmul.f32 %v157_v35, %v53_v30 }
  0x46   :  { %v159_v37 = vpop.eup %158  ;;  %v56_v38 = vsub.f32 2.0, %v55_v36 }
  0x47   :  { %v73_v39 = vmul.f32 %v159_v37, %v71_v32 }
  0x48   :  { %v57_v40 = vmul.f32 %v157_v35, %v56_v38 }
  0x49   :  { %v161_v42 = vpop.eup %160  ;;  %v74_v43 = vsub.f32 2.0, %v73_v39 }
  0x4a   :  { %v91_v44 = vmul.f32 %v161_v42, %v89_v34  ;;  %v96_v47 = vmul.f32 %v95_v41, %v57_v40 }
  0x4b   :  { %v75_v46 = vmul.f32 %v159_v37, %v74_v43 }
  0x4c   :  { %v92_v48 = vsub.f32 2.0, %v91_v44 }
  0x4d   :  { %v99_v49 = vmul.f32 %v98_v45, %v75_v46 }
  0x4e   :  { %v93_v51 = vmul.f32 %v161_v42, %v92_v48 }
  0x4f   :  { %v100_v52 = vadd.f32 %v99_v49, %v96_v47 }
  0x50   :  { %v103_v53 = vmul.f32 %v102_v50, %v93_v51 }
  0x52   :  { %v104_v55 = vadd.f32 %v103_v53, %v100_v52 }
  0x54   :  { %v107_v56 = vadd.f32 %v106_v54, %v104_v55 }
  0x56   :  { %v108_v57 = vsub.f32 0.0, %v107_v56 }
  0x58   :  { %v109_v58 = vmul.f32 1.442695, %v108_v57 }
  0x5a   :  { %162 = vpow2.f32 %v109_v58 }
  0x67   :  { %v163_v59 = vpop.eup %162 }
  0x68   :  { %v111_v60 = vadd.f32 1.0, %v163_v59 }
  0x6a   :  { %164 = vrcp.f32 %v111_v60 }
  0x77   :  { %v165_v61 = vpop.eup %164 }
  0x78   :  { %v113_v62 = vmul.f32 %v165_v61, %v111_v60 }
  0x7a   :  { %v114_v63 = vsub.f32 2.0, %v113_v62 }
  0x7c   :  { %v115_v0 = vmul.f32 %v165_v61, %v114_v63 }
  0x7e   :  { %116 = vst [vmem:[#allocation7] sm:$0xff] %v115_v0 }
  0x7f   :  { %205 = shalt.err (!%p202_p9)
}
  0x80   :  { %126 = dma.vmem_to_hbm [thread:$0]  %s124_s3, 128, %s251_s2, [#allocation4]  }
  0x81   :  { %218 = dma.done.wait [#allocation4], 128  }
  0x82   :  { %219 = vsyncadd [#allocation4], 4294967168 }
  0x83   :  { %130 = vsyncpa [#allocation3], 1 }
  0x84   :  { %131 = vsyncpa [#allocation4], 1 }
  0x85   :  { %132 = vsyncpa [#allocation5], 1 }

</bundles_post_ra>
